<compile_context>
chip_gen: v7x
topology: tpu7x:2x2x1
jax: 0.10.0
libtpu: 0.0.40
codegen_flags: <defaults>
</compile_context>

<pallas_src>
import functools

import jax
import jax.numpy as jnp
from jax import lax
from jax.experimental import pallas as pl
from jax.experimental.pallas import tpu as pltpu

LANE = 128       # pad all feature / hidden / class dims to this (lane-dense)
TILE = 256       # max node-row tile and adjacency-contraction tile
NEG_INF = -1e9   # mask value for padded class lanes (keeps log-softmax exact)


def _round_up(x, m):
    return ((x + m - 1) // m) * m


# ---------------------------------------------------------------------------
# Stage A: fused dual projection  [P0 | P1] = X @ [W0^T | W1^T]
#   One wide (F, 2H) matmul per row tile; P0 kept f32 (exact T0 term),
#   P1 emitted bf16 for the Stage-B MXU contraction.
# ---------------------------------------------------------------------------
def _dual_proj_kernel(x_ref, wcat_ref, p0_ref, p1_ref, *, h):
    full = jnp.dot(x_ref[...], wcat_ref[...],
                   preferred_element_type=jnp.float32)
    p0_ref[...] = full[:, :h].astype(p0_ref.dtype)     # lane-aligned split
    p1_ref[...] = full[:, h:].astype(p1_ref.dtype)


def _dual_project(x, wcat, *, h, tile_m):
    n, f = x.shape
    kernel = functools.partial(_dual_proj_kernel, h=h)
    flops = 2 * n * f * (2 * h)
    bytes_accessed = n * f * 2 + f * 2 * h * 2 + n * h * (4 + 2)
    return pl.pallas_call(
        kernel,
        out_shape=(jax.ShapeDtypeStruct((n, h), jnp.float32),    # P0 (T0 term)
                   jax.ShapeDtypeStruct((n, h), jnp.bfloat16)),  # P1 (T1 operand)
        grid_spec=pltpu.PrefetchScalarGridSpec(
            num_scalar_prefetch=0,
            grid=(n // tile_m,),
            in_specs=[pl.BlockSpec((tile_m, f), lambda i: (i, 0)),
                      pl.BlockSpec((f, 2 * h), lambda i: (0, 0))],
            out_specs=[pl.BlockSpec((tile_m, h), lambda i: (i, 0)),
                       pl.BlockSpec((tile_m, h), lambda i: (i, 0))],
        ),
        compiler_params=pltpu.CompilerParams(
            dimension_semantics=("parallel",)),
        cost_estimate=pl.CostEstimate(flops=flops, transcendentals=0,
                                      bytes_accessed=bytes_accessed),
    )(x, wcat)


# ---------------------------------------------------------------------------
# Stage B: propagation  out = act(L_hat @ P1 + P0 + b)
#   grid = (row tiles [parallel], contraction tiles [arbitrary, last])
#   f32 accumulator in VMEM; init at k==0, finalize (add T0 + bias, then relu
#   or fused log-softmax) at the last k. No matmul in the finalize.
# ---------------------------------------------------------------------------
def _cheb_prop_kernel(l_ref, p1_ref, p0_ref, b_ref, o_ref, acc_ref, *,
                      last_stage):
    k = pl.program_id(1)

    @pl.when(k == 0)
    def _init():
        acc_ref[...] = jnp.zeros_like(acc_ref)

    acc_ref[...] += jnp.dot(l_ref[...], p1_ref[...],
                            preferred_element_type=jnp.float32)

    @pl.when(k == pl.num_programs(1) - 1)
    def _finalize():
        h = acc_ref[...] + p0_ref[...] + b_ref[...]
        if last_stage:
            # log_softmax(dim=1); padded class lanes carry bias=-1e9 -> exp==0
            m = jnp.max(h, axis=1, keepdims=True)
            s = h - m
            lse = jnp.log(jnp.sum(jnp.exp(s), axis=1, keepdims=True))
            o_ref[...] = (s - lse).astype(o_ref.dtype)
        else:
            o_ref[...] = jnp.maximum(h, 0.0).astype(o_ref.dtype)


def _cheb_layer(l_hat, x, wcat, b, *, h, tile, last_stage):
    n = x.shape[0]

    # Stage A: resident (N, H) projections of both Chebyshev terms.
    p0, p1 = _dual_project(x, wcat, h=h, tile_m=tile)

    out_dtype = jnp.float32 if last_stage else jnp.bfloat16
    flops = 2 * n * n * h
    transcendentals = n * h if last_stage else 0
    bytes_accessed = (n * n * 2                      # L_hat (bf16)
                      + (n // tile) * n * h * 2      # P1 streamed per row tile
                      + n * h * 4                    # P0 (f32, resident per row tile)
                      + h * 4                        # bias
                      + n * h * (4 if last_stage else 2))

    kernel = functools.partial(_cheb_prop_kernel, last_stage=last_stage)
    return pl.pallas_call(
        kernel,
        out_shape=jax.ShapeDtypeStruct((n, h), out_dtype),
        grid_spec=pltpu.PrefetchScalarGridSpec(
            num_scalar_prefetch=0,
            grid=(n // tile, n // tile),
            in_specs=[
                pl.BlockSpec((tile, tile), lambda i, k: (i, k)),  # L_hat
                pl.BlockSpec((tile, h), lambda i, k: (k, 0)),     # P1 (contraction)
                pl.BlockSpec((tile, h), lambda i, k: (i, 0)),     # P0 (resident)
                pl.BlockSpec((1, h), lambda i, k: (0, 0)),        # bias
            ],
            out_specs=pl.BlockSpec((tile, h), lambda i, k: (i, 0)),
            scratch_shapes=[pltpu.VMEM((tile, h), jnp.float32)],
        ),
        compiler_params=pltpu.CompilerParams(
            dimension_semantics=("parallel", "arbitrary")),
        cost_estimate=pl.CostEstimate(flops=flops,
                                      transcendentals=transcendentals,
                                      bytes_accessed=bytes_accessed),
    )(l_hat, p1, p0, b)


# ---------------------------------------------------------------------------
# Wrapper glue (plain JAX): graph normalization, padding, weight packing
# ---------------------------------------------------------------------------
def build_cheb_norm(edge_index, num_nodes, lambda_max=2.0):
    """Dense scaled Laplacian used by PyG ChebConv:
       L_hat = (2/lambda_max) * (I - D^-1/2 A D^-1/2) - I
    Self loops removed first; duplicate edges scatter-add (PyG semantics)."""
    src = edge_index[0]
    dst = edge_index[1]
    keep = (src != dst).astype(jnp.float32)
    deg = jnp.zeros((num_nodes,), jnp.float32).at[src].add(keep)
    dinv = jnp.where(deg > 0, lax.rsqrt(deg), 0.0)
    w = -(2.0 / lambda_max) * dinv[src] * dinv[dst] * keep
    l_hat = jnp.zeros((num_nodes, num_nodes), jnp.float32).at[dst, src].add(w)
    idx = jnp.arange(num_nodes)
    l_hat = l_hat.at[idx, idx].add(2.0 / lambda_max - 1.0)
    return l_hat


def _pad_weight_cat(w0, w1, in_pad, out_pad):
    """Torch-style (out, in) weights -> transposed, concatenated, zero-padded
    bf16 (in_pad, 2*out_pad): [W0^T | W1^T]."""
    w0t = jnp.asarray(w0, jnp.float32).T
    w1t = jnp.asarray(w1, jnp.float32).T
    wcat = jnp.zeros((in_pad, 2 * out_pad), jnp.float32)
    wcat = wcat.at[:w0t.shape[0], :w0t.shape[1]].set(w0t)
    wcat = wcat.at[:w1t.shape[0], out_pad:out_pad + w1t.shape[1]].set(w1t)
    return wcat.astype(jnp.bfloat16)


@jax.jit
def chebnet_forward(x, l_hat, params):
    """ChebNet forward pass (eval mode). x: (N, F) f32, l_hat: (N, N) f32."""
    n, f = x.shape
    hid = params["conv1_w0"].shape[0]
    c = params["conv2_w0"].shape[0]

    tile = min(TILE, _round_up(n, LANE))
    n_pad = _round_up(n, tile)
    f_pad = _round_up(f, LANE)
    h_pad = _round_up(hid, LANE)
    c_pad = _round_up(c, LANE)

    # Lane-dense, pre-packed bf16 MXU operands (f32 accumulation in-kernel).
    xp = jnp.zeros((n_pad, f_pad), jnp.float32).at[:n, :f].set(x).astype(jnp.bfloat16)
    lp = jnp.zeros((n_pad, n_pad), jnp.float32).at[:n, :n].set(l_hat).astype(jnp.bfloat16)

    wcat1 = _pad_weight_cat(params["conv1_w0"], params["conv1_w1"], f_pad, h_pad)
    b1 = jnp.zeros((1, h_pad), jnp.float32).at[0, :hid].set(params["conv1_b"])

    wcat2 = _pad_weight_cat(params["conv2_w0"], params["conv2_w1"], h_pad, c_pad)
    b2 = jnp.full((1, c_pad), NEG_INF, jnp.float32).at[0, :c].set(params["conv2_b"])

    # conv1 + relu
    h1 = _cheb_layer(lp, xp, wcat1, b1, h=h_pad, tile=tile, last_stage=False)
    # TODO(synk): F.dropout between convs is identity in eval mode (training=False)
    # conv2 + log_softmax(dim=1) fused into the propagation finalize
    out = _cheb_layer(lp, h1, wcat2, b2, h=c_pad, tile=tile, last_stage=True)
    return out[:n, :c]


def init_params(key, num_features, hidden, num_classes):
    ks = jax.random.split(key, 6)

    def glorot(k, shape):
        return jax.random.normal(k, shape, jnp.float32) * jnp.sqrt(
            2.0 / (shape[0] + shape[1]))

    return {
        # ChebConv(num_features, hidden, K=2): two bias-free Linears + shared bias
        "conv1_w0": glorot(ks[0], (hidden, num_features)),
        "conv1_w1": glorot(ks[1], (hidden, num_features)),
        "conv1_b": jax.random.normal(ks[2], (hidden,), jnp.float32) * 0.05,
        # ChebConv(hidden, num_classes, K=2)
        "conv2_w0": glorot(ks[3], (num_classes, hidden)),
        "conv2_w1": glorot(ks[4], (num_classes, hidden)),
        "conv2_b": jax.random.normal(ks[5], (num_classes,), jnp.float32) * 0.05,
    }


if __name__ == "__main__":
    key = jax.random.PRNGKey(0)
    k_x, k_e, k_p = jax.random.split(key, 3)

    num_nodes = 16
    num_features = 8
    hidden = 32
    num_classes = 4
    num_edges = 40

    # node features (N, F)
    x = jax.random.normal(k_x, (num_nodes, num_features), jnp.float32)
    # random edge_index (2, E): row 0 = source, row 1 = target
    edge_index = jax.random.randint(k_e, (2, num_edges), 0, num_nodes, jnp.int32)

    l_hat = build_cheb_norm(edge_index, num_nodes)
    params = init_params(k_p, num_features, hidden, num_classes)

    out = chebnet_forward(x, l_hat, params)
    out = jax.block_until_ready(out)

    assert out.shape == (num_nodes, num_classes)
    # log_softmax rows should sum to ~1 after exp
    row_sums = jnp.exp(out).sum(axis=1)
    assert jnp.allclose(row_sums, 1.0, atol=1e-4)

    print("KERNEL_OK")
</pallas_src>

<mosaic_0001>
module attributes {stable_mosaic.version = 11 : i64} {
  func.func @_dual_proj_kernel(%arg0: i32, %arg1: memref<128x128xbf16, #tpu.memory_space<vmem>>, %arg2: memref<128x256xbf16, #tpu.memory_space<vmem>>, %arg3: memref<128x128xf32, #tpu.memory_space<vmem>>, %arg4: memref<128x128xbf16, #tpu.memory_space<vmem>>) attributes {dimension_semantics = [#tpu.dimension_semantics<parallel>], iteration_bounds = array<i64: 1>, scalar_prefetch = 0 : i64, scratch_operands = 0 : i64, tpu.core_type = #tpu.core_type<tc>, window_params = [{transform_indices = @transform_0, window_bounds = array<i64: 128, 128>}, {pipeline_mode = #tpu.pipeline_mode<synchronous>, transform_indices = @transform_1, window_bounds = array<i64: 128, 256>}, {transform_indices = @transform_2, window_bounds = array<i64: 128, 128>}, {transform_indices = @transform_3, window_bounds = array<i64: 128, 128>}]} {
    %c0 = arith.constant 0 : index
    %c0_0 = arith.constant 0 : index
    %0 = vector.load %arg1[%c0, %c0_0] : memref<128x128xbf16, #tpu.memory_space<vmem>>, vector<128x128xbf16>
    %c0_1 = arith.constant 0 : index
    %c0_2 = arith.constant 0 : index
    %1 = vector.load %arg2[%c0_1, %c0_2] : memref<128x256xbf16, #tpu.memory_space<vmem>>, vector<128x256xbf16>
    %cst = arith.constant dense<0.000000e+00> : vector<128x256xf32>
    %2 = tpu.matmul %0, %1, %cst {dimension_numbers = #tpu.dot_dimension_numbers<[1], [0], [0], [1], [0, 0, 1, 1], [], []>} : vector<128x128xbf16>, vector<128x256xbf16>, vector<128x256xf32> -> vector<128x256xf32>
    %3 = vector.extract_strided_slice %2 {offsets = [0, 0], sizes = [128, 128], strides = [1, 1]} : vector<128x256xf32> to vector<128x128xf32>
    %c0_3 = arith.constant 0 : index
    %c0_4 = arith.constant 0 : index
    %4 = vector.load %arg3[%c0_3, %c0_4] : memref<128x128xf32, #tpu.memory_space<vmem>>, vector<128x128xf32>
    tpu.vector_store %arg3[%c0_3, %c0_4], %3 {strides = array<i32>} : memref<128x128xf32, #tpu.memory_space<vmem>>, vector<128x128xf32>,
    %5 = vector.extract_strided_slice %2 {offsets = [0, 128], sizes = [128, 128], strides = [1, 1]} : vector<128x256xf32> to vector<128x128xf32>
    %6 = arith.truncf %5 : vector<128x128xf32> to vector<128x128xbf16>
    %c0_5 = arith.constant 0 : index
    %c0_6 = arith.constant 0 : index
    %7 = vector.load %arg4[%c0_5, %c0_6] : memref<128x128xbf16, #tpu.memory_space<vmem>>, vector<128x128xbf16>
    tpu.vector_store %arg4[%c0_5, %c0_6], %6 {strides = array<i32>} : memref<128x128xbf16, #tpu.memory_space<vmem>>, vector<128x128xbf16>,
    return
  }
  func.func @transform_0(%arg0: i32) -> (i32, i32) {
    %c0_i32 = arith.constant 0 : i32
    %c0_i32_0 = arith.constant 0 : i32
    return %arg0, %c0_i32 : i32, i32
  }
  func.func @transform_1(%arg0: i32) -> (i32, i32) {
    %c0_i32 = arith.constant 0 : i32
    %c0_i32_0 = arith.constant 0 : i32
    %c0_i32_1 = arith.constant 0 : i32
    return %c0_i32, %c0_i32_0 : i32, i32
  }
  func.func @transform_2(%arg0: i32) -> (i32, i32) {
    %c0_i32 = arith.constant 0 : i32
    %c0_i32_0 = arith.constant 0 : i32
    return %arg0, %c0_i32 : i32, i32
  }
  func.func @transform_3(%arg0: i32) -> (i32, i32) {
    %c0_i32 = arith.constant 0 : i32
    %c0_i32_0 = arith.constant 0 : i32
    return %arg0, %c0_i32 : i32, i32
  }
}

module attributes {stable_mosaic.version = 11 : i64} {
  func.func @_cheb_prop_kernel(%arg0: i32, %arg1: i32, %arg2: memref<128x128xbf16, #tpu.memory_space<vmem>>, %arg3: memref<128x128xbf16, #tpu.memory_space<vmem>>, %arg4: memref<128x128xf32, #tpu.memory_space<vmem>>, %arg5: memref<1x128xf32, #tpu.memory_space<vmem>>, %arg6: memref<128x128xbf16, #tpu.memory_space<vmem>>, %arg7: memref<128x128xf32, #tpu.memory_space<vmem>>) attributes {dimension_semantics = [#tpu.dimension_semantics<parallel>, #tpu.dimension_semantics<arbitrary>], iteration_bounds = array<i64: 1, 1>, scalar_prefetch = 0 : i64, scratch_operands = 1 : i64, tpu.core_type = #tpu.core_type<tc>, window_params = [{transform_indices = @transform_0, window_bounds = array<i64: 128, 128>}, {transform_indices = @transform_1, window_bounds = array<i64: 128, 128>}, {transform_indices = @transform_2, window_bounds = array<i64: 128, 128>}, {pipeline_mode = #tpu.pipeline_mode<synchronous>, transform_indices = @transform_3, window_bounds = array<i64: 1, 128>}, {transform_indices = @transform_4, window_bounds = array<i64: 128, 128>}]} {
    %c0_i32 = arith.constant 0 : i32
    %0 = arith.cmpi eq, %arg1, %c0_i32 : i32
    %1 = arith.extui %0 : i1 to i32
    %c0_i32_0 = arith.constant 0 : i32
    %2 = arith.cmpi ne, %1, %c0_i32_0 : i32
    scf.if %2 {
      %cst_10 = arith.constant 0.000000e+00 : f32
      %12 = vector.broadcast %cst_10 : f32 to vector<128x128xf32>
      %c0_11 = arith.constant 0 : index
      %c0_12 = arith.constant 0 : index
      %13 = vector.load %arg7[%c0_11, %c0_12] : memref<128x128xf32, #tpu.memory_space<vmem>>, vector<128x128xf32>
      tpu.vector_store %arg7[%c0_11, %c0_12], %12 {strides = array<i32>} : memref<128x128xf32, #tpu.memory_space<vmem>>, vector<128x128xf32>,
    } else {
    }
    %c0 = arith.constant 0 : index
    %c0_1 = arith.constant 0 : index
    %3 = vector.load %arg7[%c0, %c0_1] : memref<128x128xf32, #tpu.memory_space<vmem>>, vector<128x128xf32>
    %c0_2 = arith.constant 0 : index
    %c0_3 = arith.constant 0 : index
    %4 = vector.load %arg2[%c0_2, %c0_3] : memref<128x128xbf16, #tpu.memory_space<vmem>>, vector<128x128xbf16>
    %c0_4 = arith.constant 0 : index
    %c0_5 = arith.constant 0 : index
    %5 = vector.load %arg3[%c0_4, %c0_5] : memref<128x128xbf16, #tpu.memory_space<vmem>>, vector<128x128xbf16>
    %cst = arith.constant dense<0.000000e+00> : vector<128x128xf32>
    %6 = tpu.matmul %4, %5, %cst {dimension_numbers = #tpu.dot_dimension_numbers<[1], [0], [0], [1], [0, 0, 1, 1], [], []>} : vector<128x128xbf16>, vector<128x128xbf16>, vector<128x128xf32> -> vector<128x128xf32>
    %7 = arith.addf %3, %6 : vector<128x128xf32>
    %c0_6 = arith.constant 0 : index
    %c0_7 = arith.constant 0 : index
    %8 = vector.load %arg7[%c0_6, %c0_7] : memref<128x128xf32, #tpu.memory_space<vmem>>, vector<128x128xf32>
    tpu.vector_store %arg7[%c0_6, %c0_7], %7 {strides = array<i32>} : memref<128x128xf32, #tpu.memory_space<vmem>>, vector<128x128xf32>,
    %c0_i32_8 = arith.constant 0 : i32
    %9 = arith.cmpi eq, %arg1, %c0_i32_8 : i32
    %10 = arith.extui %9 : i1 to i32
    %c0_i32_9 = arith.constant 0 : i32
    %11 = arith.cmpi ne, %10, %c0_i32_9 : i32
    scf.if %11 {
      %c0_10 = arith.constant 0 : index
      %c0_11 = arith.constant 0 : index
      %12 = vector.load %arg7[%c0_10, %c0_11] : memref<128x128xf32, #tpu.memory_space<vmem>>, vector<128x128xf32>
      %c0_12 = arith.constant 0 : index
      %c0_13 = arith.constant 0 : index
      %13 = vector.load %arg4[%c0_12, %c0_13] : memref<128x128xf32, #tpu.memory_space<vmem>>, vector<128x128xf32>
      %14 = arith.addf %12, %13 : vector<128x128xf32>
      %c0_14 = arith.constant 0 : index
      %c0_15 = arith.constant 0 : index
      %15 = vector.load %arg5[%c0_14, %c0_15] : memref<1x128xf32, #tpu.memory_space<vmem>>, vector<1x128xf32>
      %16 = vector.broadcast %15 : vector<1x128xf32> to vector<128x128xf32>
      %17 = arith.addf %14, %16 : vector<128x128xf32>
      %cst_16 = arith.constant 0.000000e+00 : f32
      %18 = vector.broadcast %cst_16 : f32 to vector<128x128xf32>
      %19 = arith.maximumf %17, %18 : vector<128x128xf32>
      %20 = arith.truncf %19 : vector<128x128xf32> to vector<128x128xbf16>
      %c0_17 = arith.constant 0 : index
      %c0_18 = arith.constant 0 : index
      %21 = vector.load %arg6[%c0_17, %c0_18] : memref<128x128xbf16, #tpu.memory_space<vmem>>, vector<128x128xbf16>
      tpu.vector_store %arg6[%c0_17, %c0_18], %20 {strides = array<i32>} : memref<128x128xbf16, #tpu.memory_space<vmem>>, vector<128x128xbf16>,
    } else {
    }
    return
  }
  func.func @transform_0(%arg0: i32, %arg1: i32) -> (i32, i32) {
    %c0_i32 = arith.constant 0 : i32
    return %arg0, %arg1 : i32, i32
  }
  func.func @transform_1(%arg0: i32, %arg1: i32) -> (i32, i32) {
    %c0_i32 = arith.constant 0 : i32
    %c0_i32_0 = arith.constant 0 : i32
    return %arg1, %c0_i32 : i32, i32
  }
  func.func @transform_2(%arg0: i32, %arg1: i32) -> (i32, i32) {
    %c0_i32 = arith.constant 0 : i32
    %c0_i32_0 = arith.constant 0 : i32
    return %arg0, %c0_i32 : i32, i32
  }
  func.func @transform_3(%arg0: i32, %arg1: i32) -> (i32, i32) {
    %c0_i32 = arith.constant 0 : i32
    %c0_i32_0 = arith.constant 0 : i32
    %c0_i32_1 = arith.constant 0 : i32
    return %c0_i32, %c0_i32_0 : i32, i32
  }
  func.func @transform_4(%arg0: i32, %arg1: i32) -> (i32, i32) {
    %c0_i32 = arith.constant 0 : i32
    %c0_i32_0 = arith.constant 0 : i32
    return %arg0, %c0_i32 : i32, i32
  }
}

module attributes {stable_mosaic.version = 11 : i64} {
  func.func @_cheb_prop_kernel(%arg0: i32, %arg1: i32, %arg2: memref<128x128xbf16, #tpu.memory_space<vmem>>, %arg3: memref<128x128xbf16, #tpu.memory_space<vmem>>, %arg4: memref<128x128xf32, #tpu.memory_space<vmem>>, %arg5: memref<1x128xf32, #tpu.memory_space<vmem>>, %arg6: memref<128x128xf32, #tpu.memory_space<vmem>>, %arg7: memref<128x128xf32, #tpu.memory_space<vmem>>) attributes {dimension_semantics = [#tpu.dimension_semantics<parallel>, #tpu.dimension_semantics<arbitrary>], iteration_bounds = array<i64: 1, 1>, scalar_prefetch = 0 : i64, scratch_operands = 1 : i64, tpu.core_type = #tpu.core_type<tc>, window_params = [{transform_indices = @transform_0, window_bounds = array<i64: 128, 128>}, {transform_indices = @transform_1, window_bounds = array<i64: 128, 128>}, {transform_indices = @transform_2, window_bounds = array<i64: 128, 128>}, {pipeline_mode = #tpu.pipeline_mode<synchronous>, transform_indices = @transform_3, window_bounds = array<i64: 1, 128>}, {transform_indices = @transform_4, window_bounds = array<i64: 128, 128>}]} {
    %c0_i32 = arith.constant 0 : i32
    %0 = arith.cmpi eq, %arg1, %c0_i32 : i32
    %1 = arith.extui %0 : i1 to i32
    %c0_i32_0 = arith.constant 0 : i32
    %2 = arith.cmpi ne, %1, %c0_i32_0 : i32
    scf.if %2 {
      %cst_10 = arith.constant 0.000000e+00 : f32
      %12 = vector.broadcast %cst_10 : f32 to vector<128x128xf32>
      %c0_11 = arith.constant 0 : index
      %c0_12 = arith.constant 0 : index
      %13 = vector.load %arg7[%c0_11, %c0_12] : memref<128x128xf32, #tpu.memory_space<vmem>>, vector<128x128xf32>
      tpu.vector_store %arg7[%c0_11, %c0_12], %12 {strides = array<i32>} : memref<128x128xf32, #tpu.memory_space<vmem>>, vector<128x128xf32>,
    } else {
    }
    %c0 = arith.constant 0 : index
    %c0_1 = arith.constant 0 : index
    %3 = vector.load %arg7[%c0, %c0_1] : memref<128x128xf32, #tpu.memory_space<vmem>>, vector<128x128xf32>
    %c0_2 = arith.constant 0 : index
    %c0_3 = arith.constant 0 : index
    %4 = vector.load %arg2[%c0_2, %c0_3] : memref<128x128xbf16, #tpu.memory_space<vmem>>, vector<128x128xbf16>
    %c0_4 = arith.constant 0 : index
    %c0_5 = arith.constant 0 : index
    %5 = vector.load %arg3[%c0_4, %c0_5] : memref<128x128xbf16, #tpu.memory_space<vmem>>, vector<128x128xbf16>
    %cst = arith.constant dense<0.000000e+00> : vector<128x128xf32>
    %6 = tpu.matmul %4, %5, %cst {dimension_numbers = #tpu.dot_dimension_numbers<[1], [0], [0], [1], [0, 0, 1, 1], [], []>} : vector<128x128xbf16>, vector<128x128xbf16>, vector<128x128xf32> -> vector<128x128xf32>
    %7 = arith.addf %3, %6 : vector<128x128xf32>
    %c0_6 = arith.constant 0 : index
    %c0_7 = arith.constant 0 : index
    %8 = vector.load %arg7[%c0_6, %c0_7] : memref<128x128xf32, #tpu.memory_space<vmem>>, vector<128x128xf32>
    tpu.vector_store %arg7[%c0_6, %c0_7], %7 {strides = array<i32>} : memref<128x128xf32, #tpu.memory_space<vmem>>, vector<128x128xf32>,
    %c0_i32_8 = arith.constant 0 : i32
    %9 = arith.cmpi eq, %arg1, %c0_i32_8 : i32
    %10 = arith.extui %9 : i1 to i32
    %c0_i32_9 = arith.constant 0 : i32
    %11 = arith.cmpi ne, %10, %c0_i32_9 : i32
    scf.if %11 {
      %c0_10 = arith.constant 0 : index
      %c0_11 = arith.constant 0 : index
      %12 = vector.load %arg7[%c0_10, %c0_11] : memref<128x128xf32, #tpu.memory_space<vmem>>, vector<128x128xf32>
      %c0_12 = arith.constant 0 : index
      %c0_13 = arith.constant 0 : index
      %13 = vector.load %arg4[%c0_12, %c0_13] : memref<128x128xf32, #tpu.memory_space<vmem>>, vector<128x128xf32>
      %14 = arith.addf %12, %13 : vector<128x128xf32>
      %c0_14 = arith.constant 0 : index
      %c0_15 = arith.constant 0 : index
      %15 = vector.load %arg5[%c0_14, %c0_15] : memref<1x128xf32, #tpu.memory_space<vmem>>, vector<1x128xf32>
      %16 = vector.broadcast %15 : vector<1x128xf32> to vector<128x128xf32>
      %17 = arith.addf %14, %16 : vector<128x128xf32>
      %cst_16 = arith.constant dense<0xFF800000> : vector<128xf32>
      %18 = vector.multi_reduction <maximumf>, %17, %cst_16 [1] : vector<128x128xf32> to vector<128xf32>
      %19 = vector.shape_cast %18 : vector<128xf32> to vector<128x1xf32>
      %20 = vector.broadcast %19 : vector<128x1xf32> to vector<128x128xf32>
      %21 = arith.subf %17, %20 : vector<128x128xf32>
      %22 = math.exp %21 : vector<128x128xf32>
      %cst_17 = arith.constant dense<0.000000e+00> : vector<128xf32>
      %23 = vector.multi_reduction <add>, %22, %cst_17 [1] : vector<128x128xf32> to vector<128xf32>
      %24 = vector.shape_cast %23 : vector<128xf32> to vector<128x1xf32>
      %25 = math.log %24 : vector<128x1xf32>
      %26 = vector.broadcast %25 : vector<128x1xf32> to vector<128x128xf32>
      %27 = arith.subf %21, %26 : vector<128x128xf32>
      %c0_18 = arith.constant 0 : index
      %c0_19 = arith.constant 0 : index
      %28 = vector.load %arg6[%c0_18, %c0_19] : memref<128x128xf32, #tpu.memory_space<vmem>>, vector<128x128xf32>
      tpu.vector_store %arg6[%c0_18, %c0_19], %27 {strides = array<i32>} : memref<128x128xf32, #tpu.memory_space<vmem>>, vector<128x128xf32>,
    } else {
    }
    return
  }
  func.func @transform_0(%arg0: i32, %arg1: i32) -> (i32, i32) {
    %c0_i32 = arith.constant 0 : i32
    return %arg0, %arg1 : i32, i32
  }
  func.func @transform_1(%arg0: i32, %arg1: i32) -> (i32, i32) {
    %c0_i32 = arith.constant 0 : i32
    %c0_i32_0 = arith.constant 0 : i32
    return %arg1, %c0_i32 : i32, i32
  }
  func.func @transform_2(%arg0: i32, %arg1: i32) -> (i32, i32) {
    %c0_i32 = arith.constant 0 : i32
    %c0_i32_0 = arith.constant 0 : i32
    return %arg0, %c0_i32 : i32, i32
  }
  func.func @transform_3(%arg0: i32, %arg1: i32) -> (i32, i32) {
    %c0_i32 = arith.constant 0 : i32
    %c0_i32_0 = arith.constant 0 : i32
    %c0_i32_1 = arith.constant 0 : i32
    return %c0_i32, %c0_i32_0 : i32, i32
  }
  func.func @transform_4(%arg0: i32, %arg1: i32) -> (i32, i32) {
    %c0_i32 = arith.constant 0 : i32
    %c0_i32_0 = arith.constant 0 : i32
    return %arg0, %c0_i32 : i32, i32
  }
}

</mosaic_0001>

<bundles_post_ra>
// kernel: chebnet_forward.4
= control target key start
LH: loop header
LB: loop body
LE: loop exit
PB: predicated region body
PF: predicated region fallthrough
CT: control target
= control target key end

     0   :  { %v543_v1 = vmov 0   ;;  %s716_s1 = inlined_call_operand.vmem [shape: bf16[128,256], index: 1, kind: input, shape index: {}]   ;;  %s717_s0 = inlined_call_operand.vmem [shape: bf16[128,128], index: 0, kind: input, shape index: {}]   ;;  %s718_s2 = inlined_call_operand.vmem [shape: f32[128,128], index: 2, kind: output, shape index: {0}]   ;;  %s719_s3 = inlined_call_operand.vmem [shape: bf16[128,128], index: 3, kind: output, shape index: {1}]  }
   0x1   :  { %v511_v0 = vld [vmem:[%s716_s1 + $0x4] ss:$8 sps:$4 sm:$0xff]   ;;  %206 = vmatprep.mubr.bf16.mxu0 %v543_v1  ;;  %246 = vmatprep.mubr.bf16.mxu1 %v543_v1  ;;  %v513_v2 = vld [vmem:[%s716_s1] ss:$8 sps:$4 sm:$0xff]   ;;  %v514_v3 = vld [vmem:[%s716_s1 + $0x14] ss:$8 sps:$4 sm:$0xff]  }
   0x2   :  { %174 = vmatprep.subr.bf16.mxu0 %v511_v0  ;;  %494 = vmatprep.subr.bf16.mxu1 %v511_v0  ;;  %v516_v4 = vld [vmem:[%s716_s1 + $0x10] ss:$8 sps:$4 sm:$0xff]   ;;  %v517_v5 = vld [vmem:[%s716_s1 + $0x24] ss:$8 sps:$4 sm:$0xff]   ;;  %v519_v6 = vld [vmem:[%s716_s1 + $0x20] ss:$8 sps:$4 sm:$0xff]  }
   0x3   :  { %175 = vmatpush1.bf16.msra.mxu0 %v513_v2  ;;  %502 = vmatpush1.bf16.msra.mxu1 %v513_v2  ;;  %v520_v7 = vld [vmem:[%s716_s1 + $0x34] ss:$8 sps:$4 sm:$0xff]   ;;  %v522_v8 = vld [vmem:[%s716_s1 + $0x30] ss:$8 sps:$4 sm:$0xff]   ;;  %v523_v9 = vld [vmem:[%s716_s1 + $0x44] ss:$8 sps:$4 sm:$0xff]  }
   0x4   :  { %176 = vmatprep.subr.bf16.mxu0 %v514_v3  ;;  %495 = vmatprep.subr.bf16.mxu1 %v514_v3  ;;  %v525_v10 = vld [vmem:[%s716_s1 + $0x40] ss:$8 sps:$4 sm:$0xff]   ;;  %v526_v11 = vld [vmem:[%s716_s1 + $0x54] ss:$8 sps:$4 sm:$0xff]   ;;  %v528_v12 = vld [vmem:[%s716_s1 + $0x50] ss:$8 sps:$4 sm:$0xff]  }
   0x5   :  { %v529_v13 = vld [vmem:[%s716_s1 + $0x64] ss:$8 sps:$4 sm:$0xff]   ;;  %v531_v14 = vld [vmem:[%s716_s1 + $0x60] ss:$8 sps:$4 sm:$0xff]   ;;  %v532_v15 = vld [vmem:[%s716_s1 + $0x74] ss:$8 sps:$4 sm:$0xff]  }
   0x6   :  { %v534_v16 = vld [vmem:[%s716_s1 + $0x70] ss:$8 sps:$4 sm:$0xff]   ;;  %v535_v17 = vld [vmem:[%s717_s0] sm:$0xff]   ;;  %v537_v19 = vld [vmem:[%s717_s0 + $0x8] sm:$0xff]  }
   0x7   :  { %177 = vmatpush1.bf16.msra.mxu0 %v516_v4  ;;  %503 = vmatpush1.bf16.msra.mxu1 %v516_v4  ;;  %v536_v18 = vld [vmem:[%s717_s0 + $0x20] sm:$0xff]   ;;  %v538_v20 = vld [vmem:[%s717_s0 + $0x28] sm:$0xff]   ;;  %v539_v21 = vld [vmem:[%s717_s0 + $0x10] sm:$0xff]  }
   0x8   :  { %178 = vmatprep.subr.bf16.mxu0 %v517_v5  ;;  %496 = vmatprep.subr.bf16.mxu1 %v517_v5  ;;  %v540_v22 = vld [vmem:[%s717_s0 + $0x30] sm:$0xff]   ;;  %v541_v23 = vld [vmem:[%s717_s0 + $0x18] sm:$0xff]  }
   0x9   :  { %v542_v24 = vld [vmem:[%s717_s0 + $0x38] sm:$0xff]  }
   0xb   :  { %179 = vmatpush1.bf16.msra.mxu0 %v519_v6  ;;  %504 = vmatpush1.bf16.msra.mxu1 %v519_v6 }
   0xc   :  { %180 = vmatprep.subr.bf16.mxu0 %v520_v7  ;;  %497 = vmatprep.subr.bf16.mxu1 %v520_v7 }
   0xf   :  { %181 = vmatpush1.bf16.msra.mxu0 %v522_v8  ;;  %505 = vmatpush1.bf16.msra.mxu1 %v522_v8 }
  0x10   :  { %182 = vmatprep.subr.bf16.mxu0 %v523_v9  ;;  %498 = vmatprep.subr.bf16.mxu1 %v523_v9 }
  0x13   :  { %183 = vmatpush1.bf16.msra.mxu0 %v525_v10  ;;  %506 = vmatpush1.bf16.msra.mxu1 %v525_v10 }
  0x14   :  { %184 = vmatprep.subr.bf16.mxu0 %v526_v11  ;;  %499 = vmatprep.subr.bf16.mxu1 %v526_v11 }
  0x17   :  { %185 = vmatpush1.bf16.msra.mxu0 %v528_v12  ;;  %507 = vmatpush1.bf16.msra.mxu1 %v528_v12 }
  0x18   :  { %186 = vmatprep.subr.bf16.mxu0 %v529_v13  ;;  %500 = vmatprep.subr.bf16.mxu1 %v529_v13 }
  0x1b   :  { %187 = vmatpush1.bf16.msra.mxu0 %v531_v14  ;;  %508 = vmatpush1.bf16.msra.mxu1 %v531_v14 }
  0x1c   :  { %188 = vmatprep.subr.bf16.mxu0 %v532_v15  ;;  %501 = vmatprep.subr.bf16.mxu1 %v532_v15 }
  0x1f   :  { %189 = vmatpush1.bf16.msra.mxu0 %v534_v16  ;;  %509 = vmatpush1.bf16.msra.mxu1 %v534_v16 }
  0x22   :  { %207 = vmatmul.mubr.bf16.vlgmr.msra.gmra.mrb[0].mxu0 %v535_v17  ;;  %247 = vmatmul.mubr.bf16.vlgmr.msra.gmra.mrb[0].mxu1 %v536_v18 }
  0x23   :  { %216 = vmatprep.mubr.bf16.mxu0 %v543_v1  ;;  %256 = vmatprep.mubr.bf16.mxu1 %v543_v1 }
  0x2a   :  { %217 = vmatmul.mubr.bf16.gmra.mrb[4].mxu0 %v537_v19  ;;  %257 = vmatmul.mubr.bf16.gmra.mrb[4].mxu1 %v538_v20 }
  0x2b   :  { %226 = vmatprep.mubr.bf16.mxu0 %v543_v1  ;;  %266 = vmatprep.mubr.bf16.mxu1 %v543_v1 }
  0x32   :  { %227 = vmatmul.mubr.bf16.gmra.mrb[8].mxu0 %v539_v21  ;;  %267 = vmatmul.mubr.bf16.gmra.mrb[8].mxu1 %v540_v22 }
  0x33   :  { %236 = vmatprep.mubr.bf16.mxu0 %v543_v1  ;;  %276 = vmatprep.mubr.bf16.mxu1 %v543_v1 }
  0x3a   :  { %237 = vmatmul.mubr.bf16.gmra.mrb[12].mxu0 %v541_v23  ;;  %277 = vmatmul.mubr.bf16.gmra.mrb[12].mxu1 %v542_v24 }
  0xf5   :  { %v208_v25 = vpop.f32.mrb[0].mxu0  ;;  %v248_v26 = vpop.f32.mrb[0].mxu1 }
  0xf6   :  { %287 = vst [vmem:[%s718_s2] sm:$0xff] %v208_v25  ;;  %295 = vst [vmem:[%s718_s2 + $0x40] sm:$0xff] %v248_v26  ;;  %v210_v27 = vpop.f32.mrb[1].mxu0  ;;  %v250_v28 = vpop.f32.mrb[1].mxu1 }
  0xf7   :  { %v212_v29 = vpop.f32.mrb[2].mxu0  ;;  %v252_v30 = vpop.f32.mrb[2].mxu1 }
  0xf8   :  { %288 = vst [vmem:[%s718_s2 + $0x8] sm:$0xff] %v212_v29  ;;  %296 = vst [vmem:[%s718_s2 + $0x48] sm:$0xff] %v252_v30  ;;  %v214_v31 = vpop.f32.mrb[3].mxu0  ;;  %v254_v32 = vpop.f32.mrb[3].mxu1 }
  0xf9   :  { %v450_v33 = vpack.c.bf16 %v214_v31, %v210_v27  ;;  %v470_v34 = vpack.c.bf16 %v254_v32, %v250_v28 }
  0xfb   :  { %451 = vst [vmem:[%s719_s3] sm:$0xff] %v450_v33   ;;  %490 = vst [vmem:[%s719_s3 + $0x20] sm:$0xff] %v470_v34  }
  0xfd   :  { %v218_v35 = vpop.f32.mrb[4].mxu0  ;;  %v258_v36 = vpop.f32.mrb[4].mxu1 }
  0xfe   :  { %289 = vst [vmem:[%s718_s2 + $0x10] sm:$0xff] %v218_v35  ;;  %297 = vst [vmem:[%s718_s2 + $0x50] sm:$0xff] %v258_v36  ;;  %v220_v37 = vpop.f32.mrb[5].mxu0  ;;  %v260_v38 = vpop.f32.mrb[5].mxu1 }
  0xff   :  { %v222_v39 = vpop.f32.mrb[6].mxu0  ;;  %v262_v40 = vpop.f32.mrb[6].mxu1 }
 0x100   :  { %290 = vst [vmem:[%s718_s2 + $0x18] sm:$0xff] %v222_v39  ;;  %298 = vst [vmem:[%s718_s2 + $0x58] sm:$0xff] %v262_v40  ;;  %v224_v41 = vpop.f32.mrb[7].mxu0  ;;  %v264_v42 = vpop.f32.mrb[7].mxu1 }
 0x101   :  { %v455_v43 = vpack.c.bf16 %v224_v41, %v220_v37  ;;  %v475_v44 = vpack.c.bf16 %v264_v42, %v260_v38 }
 0x103   :  { %487 = vst [vmem:[%s719_s3 + $0x8] sm:$0xff] %v455_v43   ;;  %491 = vst [vmem:[%s719_s3 + $0x28] sm:$0xff] %v475_v44  }
 0x105   :  { %v228_v45 = vpop.f32.mrb[8].mxu0  ;;  %v268_v46 = vpop.f32.mrb[8].mxu1 }
 0x106   :  { %291 = vst [vmem:[%s718_s2 + $0x20] sm:$0xff] %v228_v45  ;;  %299 = vst [vmem:[%s718_s2 + $0x60] sm:$0xff] %v268_v46  ;;  %v230_v47 = vpop.f32.mrb[9].mxu0  ;;  %v270_v48 = vpop.f32.mrb[9].mxu1 }
 0x107   :  { %v232_v49 = vpop.f32.mrb[10].mxu0  ;;  %v272_v50 = vpop.f32.mrb[10].mxu1 }
 0x108   :  { %292 = vst [vmem:[%s718_s2 + $0x28] sm:$0xff] %v232_v49  ;;  %300 = vst [vmem:[%s718_s2 + $0x68] sm:$0xff] %v272_v50  ;;  %v234_v51 = vpop.f32.mrb[11].mxu0  ;;  %v274_v52 = vpop.f32.mrb[11].mxu1 }
 0x109   :  { %v460_v53 = vpack.c.bf16 %v234_v51, %v230_v47  ;;  %v480_v54 = vpack.c.bf16 %v274_v52, %v270_v48 }
 0x10b   :  { %488 = vst [vmem:[%s719_s3 + $0x10] sm:$0xff] %v460_v53   ;;  %492 = vst [vmem:[%s719_s3 + $0x30] sm:$0xff] %v480_v54  }
 0x10d   :  { %v238_v55 = vpop.f32.mrb[12].mxu0  ;;  %v278_v56 = vpop.f32.mrb[12].mxu1 }
 0x10e   :  { %293 = vst [vmem:[%s718_s2 + $0x30] sm:$0xff] %v238_v55  ;;  %301 = vst [vmem:[%s718_s2 + $0x70] sm:$0xff] %v278_v56  ;;  %v240_v57 = vpop.f32.mrb[13].mxu0  ;;  %v280_v58 = vpop.f32.mrb[13].mxu1 }
 0x10f   :  { %v242_v59 = vpop.f32.mrb[14].mxu0  ;;  %v282_v60 = vpop.f32.mrb[14].mxu1 }
 0x110   :  { %294 = vst [vmem:[%s718_s2 + $0x38] sm:$0xff] %v242_v59  ;;  %302 = vst [vmem:[%s718_s2 + $0x78] sm:$0xff] %v282_v60  ;;  %v244_v61 = vpop.f32.mrb[15].mxu0  ;;  %v284_v62 = vpop.f32.mrb[15].mxu1 }
 0x111   :  { %v465_v63 = vpack.c.bf16 %v244_v61, %v240_v57  ;;  %v485_v0 = vpack.c.bf16 %v284_v62, %v280_v58 }
 0x113   :  { %489 = vst [vmem:[%s719_s3 + $0x18] sm:$0xff] %v465_v63   ;;  %493 = vst [vmem:[%s719_s3 + $0x38] sm:$0xff] %v485_v0  }

// kernel: chebnet_forward.5
= control target key start
LH: loop header
LB: loop body
LE: loop exit
PB: predicated region body
PF: predicated region fallthrough
CT: control target
= control target key end

     0   :  { %s827_s1 = inlined_call_operand.vmem [shape: bf16[128,128], index: 1, kind: input, shape index: {}]   ;;  %s828_s0 = inlined_call_operand.vmem [shape: bf16[128,128], index: 0, kind: input, shape index: {}]   ;;  %s829_s2 = inlined_call_operand.vmem [shape: f32[128,128], index: 2, kind: input, shape index: {}]   ;;  %s830_s3 = inlined_call_operand.vmem [shape: f32[1,128], index: 3, kind: input, shape index: {}]   ;;  %s831_s4 = inlined_call_operand.vmem [shape: bf16[128,128], index: 4, kind: output, shape index: {}]  }
   0x1   :  { %v645_v0 = vld [vmem:[%s827_s1] sm:$0xff]   ;;  %v646_v1 = vld [vmem:[%s827_s1 + $0x8] sm:$0xff]   ;;  %v647_v2 = vld [vmem:[%s827_s1 + $0x10] sm:$0xff]  }
   0x2   :  { %597 = vmatprep.subr.bf16.mxu0 %v645_v0  ;;  %629 = vmatprep.subr.bf16.mxu1 %v645_v0  ;;  %v648_v3 = vld [vmem:[%s827_s1 + $0x18] sm:$0xff]   ;;  %v653_v4 = vld [vmem:[%s828_s0] sm:$0xff]   ;;  %v650_v7 = vld [vmem:[%s827_s1 + $0x28] sm:$0xff]  }
   0x3   :  { %598 = vmatpush3.bf16.msra.mxu0 %v645_v0  ;;  %637 = vmatpush3.bf16.msra.mxu1 %v645_v0  ;;  %v654_v5 = vld [vmem:[%s828_s0 + $0x20] sm:$0xff]   ;;  %v651_v8 = vld [vmem:[%s827_s1 + $0x30] sm:$0xff]   ;;  %v652_v9 = vld [vmem:[%s827_s1 + $0x38] sm:$0xff]  }
   0x4   :  { %599 = vmatprep.subr.bf16.mxu0 %v646_v1  ;;  %630 = vmatprep.subr.bf16.mxu1 %v646_v1  ;;  %v649_v6 = vld [vmem:[%s827_s1 + $0x20] sm:$0xff]   ;;  %v655_v10 = vld [vmem:[%s828_s0 + $0x8] sm:$0xff]   ;;  %v657_v12 = vld [vmem:[%s828_s0 + $0x10] sm:$0xff]  }
   0x5   :  { %613 = vmatprep.mubr.bf16.mxu0 %v653_v4  ;;  %621 = vmatprep.mubr.bf16.mxu1 %v654_v5  ;;  %v656_v11 = vld [vmem:[%s828_s0 + $0x28] sm:$0xff]   ;;  %v658_v13 = vld [vmem:[%s828_s0 + $0x30] sm:$0xff]   ;;  %v659_v14 = vld [vmem:[%s828_s0 + $0x18] sm:$0xff]  }
   0x6   :  { %v660_v15 = vld [vmem:[%s828_s0 + $0x38] sm:$0xff]   ;;  %v332_v16 = vld [vmem:[%s829_s2 + $0x10] sm:$0xff]  ;;  %v330_v18 = vld [vmem:[%s829_s2] sm:$0xff] }
   0x7   :  { %600 = vmatpush3.bf16.msra.mxu0 %v646_v1  ;;  %638 = vmatpush3.bf16.msra.mxu1 %v646_v1  ;;  %v340_v17 = vld [vmem:[%s829_s2 + $0x50] sm:$0xff]  ;;  %v338_v19 = vld [vmem:[%s829_s2 + $0x40] sm:$0xff]  ;;  %v333_v23 = vld [vmem:[%s829_s2 + $0x18] sm:$0xff] }
   0x8   :  { %601 = vmatprep.subr.bf16.mxu0 %v647_v2  ;;  %631 = vmatprep.subr.bf16.mxu1 %v647_v2  ;;  %v749_v21 = vld [vmem:[%s830_s3] ss:$0 sm:$0xff]  ;;  %v341_v24 = vld [vmem:[%s829_s2 + $0x58] sm:$0xff]  ;;  %v331_v29 = vld [vmem:[%s829_s2 + $0x8] sm:$0xff] }
   0x9   :  { %v339_v30 = vld [vmem:[%s829_s2 + $0x48] sm:$0xff]  ;;  %v336_v47 = vld [vmem:[%s829_s2 + $0x30] sm:$0xff]  ;;  %v334_v51 = vld [vmem:[%s829_s2 + $0x20] sm:$0xff] }
   0xa   :  { %v344_v50 = vld [vmem:[%s829_s2 + $0x70] sm:$0xff]  ;;  %v342_v52 = vld [vmem:[%s829_s2 + $0x60] sm:$0xff]  ;;  %v337_v57 = vld [vmem:[%s829_s2 + $0x38] sm:$0xff] }
   0xb   :  { %602 = vmatpush3.bf16.msra.mxu0 %v647_v2  ;;  %639 = vmatpush3.bf16.msra.mxu1 %v647_v2  ;;  %v345_v58 = vld [vmem:[%s829_s2 + $0x78] sm:$0xff] }
   0xc   :  { %603 = vmatprep.subr.bf16.mxu0 %v648_v3  ;;  %632 = vmatprep.subr.bf16.mxu1 %v648_v3 }
   0xf   :  { %604 = vmatpush3.bf16.msra.mxu0 %v648_v3  ;;  %640 = vmatpush3.bf16.msra.mxu1 %v648_v3 }
  0x10   :  { %605 = vmatprep.subr.bf16.mxu0 %v649_v6  ;;  %633 = vmatprep.subr.bf16.mxu1 %v649_v6 }
  0x13   :  { %606 = vmatpush3.bf16.msra.mxu0 %v649_v6  ;;  %641 = vmatpush3.bf16.msra.mxu1 %v649_v6 }
  0x14   :  { %607 = vmatprep.subr.bf16.mxu0 %v650_v7  ;;  %634 = vmatprep.subr.bf16.mxu1 %v650_v7 }
  0x17   :  { %608 = vmatpush3.bf16.msra.mxu0 %v650_v7  ;;  %642 = vmatpush3.bf16.msra.mxu1 %v650_v7  ;;  %v335_v7 = vld [vmem:[%s829_s2 + $0x28] sm:$0xff] }
  0x18   :  { %609 = vmatprep.subr.bf16.mxu0 %v651_v8  ;;  %635 = vmatprep.subr.bf16.mxu1 %v651_v8 }
  0x1b   :  { %610 = vmatpush3.bf16.msra.mxu0 %v651_v8  ;;  %643 = vmatpush3.bf16.msra.mxu1 %v651_v8  ;;  %v343_v8 = vld [vmem:[%s829_s2 + $0x68] sm:$0xff] }
  0x1c   :  { %611 = vmatprep.subr.bf16.mxu0 %v652_v9  ;;  %636 = vmatprep.subr.bf16.mxu1 %v652_v9 }
  0x1f   :  { %612 = vmatpush3.bf16.msra.mxu0 %v652_v9  ;;  %644 = vmatpush3.bf16.msra.mxu1 %v652_v9 }
  0x22   :  { %614 = vmatmul.mubr.bf16.vlgmr.msra.gmra.mrb[0].mxu0 %v655_v10  ;;  %622 = vmatmul.mubr.bf16.vlgmr.msra.gmra.mrb[0].mxu1 %v656_v11 }
  0x23   :  { %617 = vmatprep.mubr.bf16.mxu0 %v657_v12  ;;  %625 = vmatprep.mubr.bf16.mxu1 %v658_v13 }
  0x2a   :  { %618 = vmatmul.mubr.bf16.gmra.mrb[4].mxu0 %v659_v14  ;;  %626 = vmatmul.mubr.bf16.gmra.mrb[4].mxu1 %v660_v15 }
  0xf5   :  { %v615_v20 = vpop.f32.mrb[0].mxu0  ;;  %v623_v22 = vpop.f32.mrb[0].mxu1 }
  0xf6   :  { %v348_v25 = vadd.f32 %v615_v20, %v332_v16  ;;  %v356_v26 = vadd.f32 %v623_v22, %v340_v17  ;;  %v216_v27 = vpop.f32.mrb[1].mxu0  ;;  %v248_v28 = vpop.f32.mrb[1].mxu1 }
  0xf7   :  { %v346_v31 = vadd.f32 %v330_v18, %v216_v27  ;;  %v354_v32 = vadd.f32 %v338_v19, %v248_v28  ;;  %v616_v33 = vpop.f32.mrb[2].mxu0  ;;  %v624_v34 = vpop.f32.mrb[2].mxu1 }
  0xf8   :  { %v371_v35 = vadd.f32 %v749_v21, %v348_v25  ;;  %v379_v36 = vadd.f32 %v749_v21, %v356_v26  ;;  %v349_v37 = vadd.f32 %v616_v33, %v333_v23  ;;  %v357_v38 = vadd.f32 %v624_v34, %v341_v24  ;;  %v219_v39 = vpop.f32.mrb[3].mxu0  ;;  %v251_v40 = vpop.f32.mrb[3].mxu1 }
  0xf9   :  { %v369_v41 = vadd.f32 %v749_v21, %v346_v31  ;;  %v377_v42 = vadd.f32 %v749_v21, %v354_v32  ;;  %v347_v43 = vadd.f32 %v331_v29, %v219_v39  ;;  %v355_v44 = vadd.f32 %v339_v30, %v251_v40 }
  0xfa   :  { %v372_v45 = vadd.f32 %v749_v21, %v349_v37  ;;  %v380_v46 = vadd.f32 %v749_v21, %v357_v38  ;;  %v387_v53 = vmax.f32 %v371_v35, 0.0  ;;  %v395_v54 = vmax.f32 %v379_v36, 0.0 }
  0xfb   :  { %v370_v48 = vadd.f32 %v749_v21, %v347_v43  ;;  %v378_v49 = vadd.f32 %v749_v21, %v355_v44  ;;  %v385_v59 = vmax.f32 %v369_v41, 0.0  ;;  %v393_v60 = vmax.f32 %v377_v42, 0.0 }
  0xfc   :  { %v388_v55 = vmax.f32 %v372_v45, 0.0  ;;  %v396_v56 = vmax.f32 %v380_v46, 0.0 }
  0xfd   :  { %v386_v61 = vmax.f32 %v370_v48, 0.0  ;;  %v394_v62 = vmax.f32 %v378_v49, 0.0  ;;  %v619_v63 = vpop.f32.mrb[4].mxu0  ;;  %v627_v0 = vpop.f32.mrb[4].mxu1 }
  0xfe   :  { %v542_v1 = vpack.c.bf16 %v388_v55, %v387_v53  ;;  %v562_v2 = vpack.c.bf16 %v396_v56, %v395_v54  ;;  %v352_v3 = vadd.f32 %v619_v63, %v336_v47  ;;  %v360_v4 = vadd.f32 %v627_v0, %v344_v50  ;;  %v232_v5 = vpop.f32.mrb[5].mxu0  ;;  %v264_v6 = vpop.f32.mrb[5].mxu1 }
  0xff   :  { %v537_v9 = vpack.c.bf16 %v386_v61, %v385_v59  ;;  %v557_v10 = vpack.c.bf16 %v394_v62, %v393_v60  ;;  %v350_v11 = vadd.f32 %v334_v51, %v232_v5  ;;  %v358_v12 = vadd.f32 %v342_v52, %v264_v6  ;;  %v620_v13 = vpop.f32.mrb[6].mxu0  ;;  %v628_v14 = vpop.f32.mrb[6].mxu1 }
 0x100   :  { %574 = vst [vmem:[%s831_s4 + $0x8] sm:$0xff] %v542_v1   ;;  %578 = vst [vmem:[%s831_s4 + $0x28] sm:$0xff] %v562_v2   ;;  %v375_v15 = vadd.f32 %v749_v21, %v352_v3  ;;  %v383_v16 = vadd.f32 %v749_v21, %v360_v4  ;;  %v353_v17 = vadd.f32 %v620_v13, %v337_v57  ;;  %v235_v19 = vpop.f32.mrb[7].mxu0  ;;  %v267_v20 = vpop.f32.mrb[7].mxu1 }
 0x101   :  { %v361_v18 = vadd.f32 %v628_v14, %v345_v58  ;;  %538 = vst [vmem:[%s831_s4] sm:$0xff] %v537_v9   ;;  %577 = vst [vmem:[%s831_s4 + $0x20] sm:$0xff] %v557_v10   ;;  %v373_v22 = vadd.f32 %v749_v21, %v350_v11  ;;  %v381_v23 = vadd.f32 %v749_v21, %v358_v12 }
 0x102   :  { %v351_v24 = vadd.f32 %v335_v7, %v235_v19  ;;  %v359_v25 = vadd.f32 %v343_v8, %v267_v20  ;;  %v376_v26 = vadd.f32 %v749_v21, %v353_v17  ;;  %v391_v30 = vmax.f32 %v375_v15, 0.0 }
 0x103   :  { %v384_v27 = vadd.f32 %v749_v21, %v361_v18  ;;  %v399_v31 = vmax.f32 %v383_v16, 0.0  ;;  %v389_v34 = vmax.f32 %v373_v22, 0.0  ;;  %v397_v35 = vmax.f32 %v381_v23, 0.0 }
 0x104   :  { %v374_v28 = vadd.f32 %v749_v21, %v351_v24  ;;  %v382_v29 = vadd.f32 %v749_v21, %v359_v25  ;;  %v392_v32 = vmax.f32 %v376_v26, 0.0 }
 0x105   :  { %v400_v33 = vmax.f32 %v384_v27, 0.0 }
 0x106   :  { %v390_v36 = vmax.f32 %v374_v28, 0.0  ;;  %v398_v37 = vmax.f32 %v382_v29, 0.0  ;;  %v552_v38 = vpack.c.bf16 %v392_v32, %v391_v30 }
 0x107   :  { %v572_v39 = vpack.c.bf16 %v400_v33, %v399_v31 }
 0x108   :  { %v547_v40 = vpack.c.bf16 %v390_v36, %v389_v34  ;;  %v567_v41 = vpack.c.bf16 %v398_v37, %v397_v35  ;;  %576 = vst [vmem:[%s831_s4 + $0x18] sm:$0xff] %v552_v38  }
 0x109   :  { %580 = vst [vmem:[%s831_s4 + $0x38] sm:$0xff] %v572_v39  }
 0x10a   :  { %575 = vst [vmem:[%s831_s4 + $0x10] sm:$0xff] %v547_v40   ;;  %579 = vst [vmem:[%s831_s4 + $0x30] sm:$0xff] %v567_v41  }

// kernel: chebnet_forward.7
= control target key start
LH: loop header
LB: loop body
LE: loop exit
PB: predicated region body
PF: predicated region fallthrough
CT: control target
= control target key end

     0   :  { %s1016_s1 = inlined_call_operand.vmem [shape: bf16[128,128], index: 1, kind: input, shape index: {}]   ;;  %s1017_s0 = inlined_call_operand.vmem [shape: bf16[128,128], index: 0, kind: input, shape index: {}]   ;;  %s1018_s2 = inlined_call_operand.vmem [shape: f32[128,128], index: 2, kind: input, shape index: {}]   ;;  %s1019_s3 = inlined_call_operand.vmem [shape: f32[1,128], index: 3, kind: input, shape index: {}]   ;;  %s1020_s4 = inlined_call_operand.vmem [shape: f32[128,128], index: 4, kind: output, shape index: {}]  }
   0x1   :  { %v646_v0 = vld [vmem:[%s1016_s1] sm:$0xff]   ;;  %v647_v1 = vld [vmem:[%s1016_s1 + $0x8] sm:$0xff]   ;;  %v648_v2 = vld [vmem:[%s1016_s1 + $0x10] sm:$0xff]  }
   0x2   :  { %598 = vmatprep.subr.bf16.mxu0 %v646_v0  ;;  %630 = vmatprep.subr.bf16.mxu1 %v646_v0  ;;  %v649_v3 = vld [vmem:[%s1016_s1 + $0x18] sm:$0xff]   ;;  %v654_v4 = vld [vmem:[%s1017_s0] sm:$0xff]   ;;  %v651_v7 = vld [vmem:[%s1016_s1 + $0x28] sm:$0xff]  }
   0x3   :  { %599 = vmatpush3.bf16.msra.mxu0 %v646_v0  ;;  %638 = vmatpush3.bf16.msra.mxu1 %v646_v0  ;;  %v655_v5 = vld [vmem:[%s1017_s0 + $0x20] sm:$0xff]   ;;  %v652_v8 = vld [vmem:[%s1016_s1 + $0x30] sm:$0xff]   ;;  %v653_v9 = vld [vmem:[%s1016_s1 + $0x38] sm:$0xff]  }
   0x4   :  { %600 = vmatprep.subr.bf16.mxu0 %v647_v1  ;;  %631 = vmatprep.subr.bf16.mxu1 %v647_v1  ;;  %v650_v6 = vld [vmem:[%s1016_s1 + $0x20] sm:$0xff]   ;;  %v656_v10 = vld [vmem:[%s1017_s0 + $0x8] sm:$0xff]   ;;  %v658_v12 = vld [vmem:[%s1017_s0 + $0x10] sm:$0xff]  }
   0x5   :  { %614 = vmatprep.mubr.bf16.mxu0 %v654_v4  ;;  %622 = vmatprep.mubr.bf16.mxu1 %v655_v5  ;;  %v657_v11 = vld [vmem:[%s1017_s0 + $0x28] sm:$0xff]   ;;  %v660_v13 = vld [vmem:[%s1017_s0 + $0x30] sm:$0xff]   ;;  %v659_v14 = vld [vmem:[%s1017_s0 + $0x18] sm:$0xff]  }
   0x6   :  { %v661_v15 = vld [vmem:[%s1017_s0 + $0x38] sm:$0xff]   ;;  %v332_v16 = vld [vmem:[%s1018_s2 + $0x10] sm:$0xff]  ;;  %v330_v20 = vld [vmem:[%s1018_s2] sm:$0xff] }
   0x7   :  { %601 = vmatpush3.bf16.msra.mxu0 %v647_v1  ;;  %639 = vmatpush3.bf16.msra.mxu1 %v647_v1  ;;  %v340_v17 = vld [vmem:[%s1018_s2 + $0x50] sm:$0xff]  ;;  %v333_v21 = vld [vmem:[%s1018_s2 + $0x18] sm:$0xff]  ;;  %v814_v22 = vld [vmem:[%s1019_s3] ss:$0 sm:$0xff] }
   0x8   :  { %602 = vmatprep.subr.bf16.mxu0 %v648_v2  ;;  %632 = vmatprep.subr.bf16.mxu1 %v648_v2  ;;  %v338_v35 = vld [vmem:[%s1018_s2 + $0x40] sm:$0xff]  ;;  %v341_v36 = vld [vmem:[%s1018_s2 + $0x58] sm:$0xff]  ;;  %v331_v41 = vld [vmem:[%s1018_s2 + $0x8] sm:$0xff] }
   0x9   :  { %v339_v42 = vld [vmem:[%s1018_s2 + $0x48] sm:$0xff]  ;;  %v336_v47 = vld [vmem:[%s1018_s2 + $0x30] sm:$0xff]  ;;  %v337_v49 = vld [vmem:[%s1018_s2 + $0x38] sm:$0xff] }
   0xa   :  { %v334_v61 = vld [vmem:[%s1018_s2 + $0x20] sm:$0xff]  ;;  %v335_v62 = vld [vmem:[%s1018_s2 + $0x28] sm:$0xff] }
   0xb   :  { %603 = vmatpush3.bf16.msra.mxu0 %v648_v2  ;;  %640 = vmatpush3.bf16.msra.mxu1 %v648_v2  ;;  %v342_v1 = vld [vmem:[%s1018_s2 + $0x60] sm:$0xff]  ;;  %v343_v2 = vld [vmem:[%s1018_s2 + $0x68] sm:$0xff] }
   0xc   :  { %604 = vmatprep.subr.bf16.mxu0 %v649_v3  ;;  %633 = vmatprep.subr.bf16.mxu1 %v649_v3 }
   0xf   :  { %605 = vmatpush3.bf16.msra.mxu0 %v649_v3  ;;  %641 = vmatpush3.bf16.msra.mxu1 %v649_v3 }
  0x10   :  { %606 = vmatprep.subr.bf16.mxu0 %v650_v6  ;;  %634 = vmatprep.subr.bf16.mxu1 %v650_v6 }
  0x13   :  { %607 = vmatpush3.bf16.msra.mxu0 %v650_v6  ;;  %642 = vmatpush3.bf16.msra.mxu1 %v650_v6 }
  0x14   :  { %608 = vmatprep.subr.bf16.mxu0 %v651_v7  ;;  %635 = vmatprep.subr.bf16.mxu1 %v651_v7 }
  0x17   :  { %609 = vmatpush3.bf16.msra.mxu0 %v651_v7  ;;  %643 = vmatpush3.bf16.msra.mxu1 %v651_v7 }
  0x18   :  { %610 = vmatprep.subr.bf16.mxu0 %v652_v8  ;;  %636 = vmatprep.subr.bf16.mxu1 %v652_v8 }
  0x1b   :  { %611 = vmatpush3.bf16.msra.mxu0 %v652_v8  ;;  %644 = vmatpush3.bf16.msra.mxu1 %v652_v8 }
  0x1c   :  { %612 = vmatprep.subr.bf16.mxu0 %v653_v9  ;;  %637 = vmatprep.subr.bf16.mxu1 %v653_v9 }
  0x1f   :  { %613 = vmatpush3.bf16.msra.mxu0 %v653_v9  ;;  %645 = vmatpush3.bf16.msra.mxu1 %v653_v9  ;;  %v344_v9 = vld [vmem:[%s1018_s2 + $0x70] sm:$0xff] }
  0x22   :  { %615 = vmatmul.mubr.bf16.vlgmr.msra.gmra.mrb[0].mxu0 %v656_v10  ;;  %623 = vmatmul.mubr.bf16.vlgmr.msra.gmra.mrb[0].mxu1 %v657_v11  ;;  %v345_v10 = vld [vmem:[%s1018_s2 + $0x78] sm:$0xff] }
  0x23   :  { %618 = vmatprep.mubr.bf16.mxu0 %v658_v12  ;;  %626 = vmatprep.mubr.bf16.mxu1 %v660_v13 }
  0x2a   :  { %619 = vmatmul.mubr.bf16.gmra.mrb[4].mxu0 %v659_v14  ;;  %627 = vmatmul.mubr.bf16.gmra.mrb[4].mxu1 %v661_v15 }
  0xf5   :  { %v616_v18 = vpop.f32.mrb[0].mxu0  ;;  %v624_v19 = vpop.f32.mrb[0].mxu1 }
  0xf6   :  { %v348_v23 = vadd.f32 %v616_v18, %v332_v16  ;;  %v356_v24 = vadd.f32 %v624_v19, %v340_v17  ;;  %v216_v25 = vpop.f32.mrb[1].mxu0  ;;  %v248_v26 = vpop.f32.mrb[1].mxu1 }
  0xf7   :  { %v617_v27 = vpop.f32.mrb[2].mxu0  ;;  %v625_v28 = vpop.f32.mrb[2].mxu1  ;;  %v346_v29 = vadd.f32 %v330_v20, %v216_v25  ;;  %v354_v37 = vadd.f32 %v338_v35, %v248_v26 }
  0xf8   :  { %v349_v30 = vadd.f32 %v617_v27, %v333_v21  ;;  %v219_v31 = vpop.f32.mrb[3].mxu0  ;;  %v251_v32 = vpop.f32.mrb[3].mxu1  ;;  %v817_v33 = vadd.f32 %v814_v22, %v356_v24  ;;  %v820_v34 = vadd.f32 %v814_v22, %v348_v23  ;;  %v357_v38 = vadd.f32 %v625_v28, %v341_v36 }
  0xf9   :  { %v831_v39 = vadd.f32 %v814_v22, %v346_v29  ;;  %v347_v51 = vadd.f32 %v331_v41, %v219_v31  ;;  %v355_v52 = vadd.f32 %v339_v42, %v251_v32  ;;  %v377_v53 = vadd.f32 %v814_v22, %v354_v37 }
  0xfa   :  { %405 = vmax.xlane.f32.xlu0 %v817_v33  ;;  %389 = vmax.xlane.f32.xlu1 %v820_v34  ;;  %v834_v40 = vadd.f32 %v814_v22, %v349_v30  ;;  %v380_v54 = vadd.f32 %v814_v22, %v357_v38 }
  0xfb   :  { %v378_v59 = vadd.f32 %v814_v22, %v355_v52  ;;  %v370_v60 = vadd.f32 %v814_v22, %v347_v51 }
  0xfd   :  { %v620_v43 = vpop.f32.mrb[4].mxu0  ;;  %v628_v44 = vpop.f32.mrb[4].mxu1 }
  0xfe   :  { %385 = vmax.xlane.f32.xlu0 %v831_v39  ;;  %391 = vmax.xlane.f32.xlu1 %v834_v40  ;;  %v232_v45 = vpop.f32.mrb[5].mxu0  ;;  %v264_v46 = vpop.f32.mrb[5].mxu1  ;;  %v352_v57 = vadd.f32 %v620_v43, %v336_v47  ;;  %v360_v13 = vadd.f32 %v628_v44, %v344_v9 }
  0xff   :  { %v621_v48 = vpop.f32.mrb[6].mxu0  ;;  %v629_v50 = vpop.f32.mrb[6].mxu1  ;;  %v350_v3 = vadd.f32 %v334_v61, %v232_v45  ;;  %v358_v5 = vadd.f32 %v342_v1, %v264_v46 }
 0x100   :  { %v235_v55 = vpop.f32.mrb[7].mxu0  ;;  %v267_v56 = vpop.f32.mrb[7].mxu1  ;;  %v353_v58 = vadd.f32 %v621_v48, %v337_v49  ;;  %v375_v63 = vadd.f32 %v814_v22, %v352_v57  ;;  %v361_v14 = vadd.f32 %v629_v50, %v345_v10  ;;  %v888_v15 = vadd.f32 %v814_v22, %v360_v13 }
 0x101   :  { %v351_v4 = vadd.f32 %v335_v62, %v235_v55  ;;  %v359_v6 = vadd.f32 %v343_v2, %v267_v56  ;;  %v373_v7 = vadd.f32 %v814_v22, %v350_v3  ;;  %v880_v11 = vadd.f32 %v814_v22, %v358_v5 }
 0x102   :  { %401 = vmax.xlane.f32.xlu0 %v377_v53  ;;  %407 = vmax.xlane.f32.xlu1 %v380_v54  ;;  %v376_v0 = vadd.f32 %v814_v22, %v353_v58  ;;  %v891_v16 = vadd.f32 %v814_v22, %v361_v14 }
 0x103   :  { %v870_v8 = vadd.f32 %v814_v22, %v351_v4  ;;  %v883_v12 = vadd.f32 %v814_v22, %v359_v6 }
 0x106   :  { %403 = vmax.xlane.f32.xlu1 %v378_v59  ;;  %387 = vmax.xlane.f32.xlu0 %v370_v60 }
 0x10a   :  { %397 = vmax.xlane.f32.xlu0 %v375_v63  ;;  %399 = vmax.xlane.f32.xlu1 %v376_v0 }
 0x10e   :  { %393 = vmax.xlane.f32.xlu0 %v373_v7  ;;  %395 = vmax.xlane.f32.xlu1 %v870_v8 }
 0x112   :  { %409 = vmax.xlane.f32.xlu0 %v880_v11  ;;  %411 = vmax.xlane.f32.xlu1 %v883_v12 }
 0x116   :  { %413 = vmax.xlane.f32.xlu0 %v888_v15  ;;  %415 = vmax.xlane.f32.xlu1 %v891_v16 }
 0x187   :  { %v406_v17 = vpop.xlane.xlu0 %405  ;;  %v390_v18 = vpop.xlane.xlu1 %389 }
 0x188   :  { %v896_v19 = vsub.f32 %v817_v33, %v406_v17  ;;  %v899_v20 = vsub.f32 %v820_v34, %v390_v18 }
 0x18a   :  { %v437_v21 = vmul.f32 1.442695, %v899_v20  ;;  %v453_v25 = vmul.f32 1.442695, %v896_v19 }
 0x18b   :  { %v386_v23 = vpop.xlane.xlu0 %385  ;;  %v392_v24 = vpop.xlane.xlu1 %391 }
 0x18c   :  { %v904_v22 = vsub.f32 %v831_v39, %v386_v23  ;;  %v907_v26 = vsub.f32 %v834_v40, %v392_v24  ;;  %662 = vpow2.f32 %v437_v21 }
 0x18d   :  { %664 = vpow2.f32 %v453_v25 }
 0x18e   :  { %v439_v27 = vmul.f32 1.442695, %v907_v26  ;;  %v433_v30 = vmul.f32 1.442695, %v904_v22 }
 0x18f   :  { %v402_v28 = vpop.xlane.xlu0 %401  ;;  %v408_v29 = vpop.xlane.xlu1 %407 }
 0x190   :  { %v911_v31 = vsub.f32 %v377_v53, %v402_v28  ;;  %v913_v32 = vsub.f32 %v380_v54, %v408_v29  ;;  %666 = vpow2.f32 %v439_v27 }
 0x191   :  { %668 = vpow2.f32 %v433_v30 }
 0x192   :  { %v455_v33 = vmul.f32 1.442695, %v913_v32  ;;  %v449_v36 = vmul.f32 1.442695, %v911_v31 }
 0x193   :  { %v404_v34 = vpop.xlane.xlu1 %403  ;;  %v388_v35 = vpop.xlane.xlu0 %387 }
 0x194   :  { %v917_v37 = vsub.f32 %v370_v60, %v388_v35  ;;  %670 = vpow2.f32 %v455_v33  ;;  %v919_v38 = vsub.f32 %v378_v59, %v404_v34 }
 0x195   :  { %672 = vpow2.f32 %v449_v36 }
 0x196   :  { %v435_v39 = vmul.f32 1.442695, %v917_v37  ;;  %v663_v40 = vpop.eup %662  ;;  %v451_v44 = vmul.f32 1.442695, %v919_v38 }
 0x197   :  { %v398_v41 = vpop.xlane.xlu0 %397  ;;  %v400_v42 = vpop.xlane.xlu1 %399  ;;  %469 = vadd.xlane.f32.xlu0 %v663_v40 }
 0x198   :  { %v922_v43 = vsub.f32 %v375_v63, %v398_v41  ;;  %674 = vpow2.f32 %v435_v39  ;;  %v925_v45 = vsub.f32 %v376_v0, %v400_v42  ;;  %v665_v46 = vpop.eup %664 }
 0x19a   :  { %v445_v47 = vmul.f32 1.442695, %v922_v43  ;;  %v667_v48 = vpop.eup %666  ;;  %v447_v52 = vmul.f32 1.442695, %v925_v45 }
 0x19b   :  { %v394_v49 = vpop.xlane.xlu0 %393  ;;  %v396_v50 = vpop.xlane.xlu1 %395  ;;  %485 = vadd.xlane.f32.xlu0 %v665_v46  ;;  %471 = vadd.xlane.f32.xlu1 %v667_v48 }
 0x19c   :  { %676 = vpow2.f32 %v445_v47  ;;  %v928_v51 = vsub.f32 %v373_v7, %v394_v49  ;;  %v932_v53 = vsub.f32 %v870_v8, %v396_v50  ;;  %v669_v54 = vpop.eup %668 }
 0x19d   :  { %678 = vpow2.f32 %v451_v44 }
 0x19e   :  { %v441_v55 = vmul.f32 1.442695, %v928_v51  ;;  %v671_v56 = vpop.eup %670  ;;  %v443_v60 = vmul.f32 1.442695, %v932_v53 }
 0x19f   :  { %v410_v57 = vpop.xlane.xlu0 %409  ;;  %v412_v58 = vpop.xlane.xlu1 %411  ;;  %465 = vadd.xlane.f32.xlu0 %v669_v54  ;;  %487 = vadd.xlane.f32.xlu1 %v671_v56 }
 0x1a0   :  { %680 = vpow2.f32 %v441_v55  ;;  %v936_v59 = vsub.f32 %v880_v11, %v410_v57  ;;  %v940_v61 = vsub.f32 %v883_v12, %v412_v58  ;;  %v673_v62 = vpop.eup %672 }
 0x1a1   :  { %682 = vpow2.f32 %v447_v52 }
 0x1a2   :  { %v457_v63 = vmul.f32 1.442695, %v936_v59  ;;  %v675_v0 = vpop.eup %674  ;;  %v459_v4 = vmul.f32 1.442695, %v940_v61 }
 0x1a3   :  { %v414_v1 = vpop.xlane.xlu0 %413  ;;  %v416_v2 = vpop.xlane.xlu1 %415  ;;  %481 = vadd.xlane.f32.xlu0 %v673_v62  ;;  %467 = vadd.xlane.f32.xlu1 %v675_v0 }
 0x1a4   :  { %684 = vpow2.f32 %v457_v63  ;;  %v944_v3 = vsub.f32 %v888_v15, %v414_v1  ;;  %v948_v5 = vsub.f32 %v891_v16, %v416_v2 }
 0x1a5   :  { %686 = vpow2.f32 %v443_v60 }
 0x1a6   :  { %v677_v6 = vpop.eup %676  ;;  %v461_v7 = vmul.f32 1.442695, %v944_v3  ;;  %v463_v9 = vmul.f32 1.442695, %v948_v5 }
 0x1a7   :  { %v679_v8 = vpop.eup %678  ;;  %477 = vadd.xlane.f32.xlu0 %v677_v6 }
 0x1a8   :  { %688 = vpow2.f32 %v461_v7  ;;  %483 = vadd.xlane.f32.xlu1 %v679_v8 }
 0x1a9   :  { %690 = vpow2.f32 %v459_v4 }
 0x1aa   :  { %v681_v10 = vpop.eup %680  ;;  %692 = vpow2.f32 %v463_v9 }
 0x1ab   :  { %v683_v11 = vpop.eup %682  ;;  %473 = vadd.xlane.f32.xlu0 %v681_v10 }
 0x1ac   :  { %479 = vadd.xlane.f32.xlu1 %v683_v11 }
 0x1ae   :  { %v685_v12 = vpop.eup %684 }
 0x1af   :  { %v687_v13 = vpop.eup %686  ;;  %489 = vadd.xlane.f32.xlu0 %v685_v12 }
 0x1b0   :  { %475 = vadd.xlane.f32.xlu1 %v687_v13 }
 0x1b2   :  { %v689_v14 = vpop.eup %688 }
 0x1b3   :  { %v691_v15 = vpop.eup %690  ;;  %493 = vadd.xlane.f32.xlu0 %v689_v14 }
 0x1b4   :  { %491 = vadd.xlane.f32.xlu1 %v691_v15  ;;  %v693_v16 = vpop.eup %692 }
 0x1b8   :  { %495 = vadd.xlane.f32.xlu1 %v693_v16 }
 0x224   :  { %v470_v17 = vpop.xlane.xlu0 %469 }
 0x225   :  { %694 = vlog2.f32 %v470_v17 }
 0x228   :  { %v486_v18 = vpop.xlane.xlu0 %485  ;;  %v472_v21 = vpop.xlane.xlu1 %471 }
 0x229   :  { %696 = vlog2.f32 %v486_v18 }
 0x22a   :  { %698 = vlog2.f32 %v472_v21 }
 0x22c   :  { %v466_v23 = vpop.xlane.xlu0 %465  ;;  %v488_v24 = vpop.xlane.xlu1 %487 }
 0x22d   :  { %700 = vlog2.f32 %v466_v23 }
 0x22e   :  { %702 = vlog2.f32 %v488_v24 }
 0x22f   :  { %v695_v25 = vpop.eup %694 }
 0x230   :  { %v502_v27 = vmul.f32 0.6931472, %v695_v25  ;;  %v482_v28 = vpop.xlane.xlu0 %481  ;;  %v468_v29 = vpop.xlane.xlu1 %467 }
 0x231   :  { %704 = vlog2.f32 %v482_v28 }
 0x232   :  { %v531_v30 = vsub.f32 %v899_v20, %v502_v27  ;;  %706 = vlog2.f32 %v468_v29 }
 0x233   :  { %v697_v33 = vpop.eup %696 }
 0x234   :  { %v699_v34 = vpop.eup %698  ;;  %547 = vst [vmem:[%s1020_s4 + $0x10] sm:$0xff] %v531_v30  ;;  %v518_v35 = vmul.f32 0.6931472, %v697_v33  ;;  %v478_v36 = vpop.xlane.xlu0 %477 }
 0x235   :  { %v484_v39 = vpop.xlane.xlu1 %483  ;;  %v504_v40 = vmul.f32 0.6931472, %v699_v34  ;;  %708 = vlog2.f32 %v478_v36 }
 0x236   :  { %v539_v41 = vsub.f32 %v896_v19, %v518_v35  ;;  %710 = vlog2.f32 %v484_v39 }
 0x237   :  { %v701_v42 = vpop.eup %700  ;;  %v532_v44 = vsub.f32 %v907_v26, %v504_v40 }
 0x238   :  { %v703_v46 = vpop.eup %702  ;;  %555 = vst [vmem:[%s1020_s4 + $0x50] sm:$0xff] %v539_v41  ;;  %v498_v20 = vmul.f32 0.6931472, %v701_v42  ;;  %v474_v47 = vpop.xlane.xlu0 %473 }
 0x239   :  { %v480_v48 = vpop.xlane.xlu1 %479  ;;  %548 = vst [vmem:[%s1020_s4 + $0x18] sm:$0xff] %v532_v44  ;;  %v520_v49 = vmul.f32 0.6931472, %v703_v46  ;;  %712 = vlog2.f32 %v474_v47 }
 0x23a   :  { %v529_v19 = vsub.f32 %v904_v22, %v498_v20  ;;  %714 = vlog2.f32 %v480_v48 }
 0x23b   :  { %v705_v50 = vpop.eup %704  ;;  %v540_v26 = vsub.f32 %v913_v32, %v520_v49 }
 0x23c   :  { %v707_v52 = vpop.eup %706  ;;  %545 = vst [vmem:[%s1020_s4] sm:$0xff] %v529_v19  ;;  %v514_v54 = vmul.f32 0.6931472, %v705_v50  ;;  %v490_v55 = vpop.xlane.xlu0 %489 }
 0x23d   :  { %v476_v56 = vpop.xlane.xlu1 %475  ;;  %556 = vst [vmem:[%s1020_s4 + $0x58] sm:$0xff] %v540_v26  ;;  %v500_v57 = vmul.f32 0.6931472, %v707_v52  ;;  %716 = vlog2.f32 %v490_v55 }
 0x23e   :  { %v537_v22 = vsub.f32 %v911_v31, %v514_v54  ;;  %718 = vlog2.f32 %v476_v56 }
 0x23f   :  { %v709_v58 = vpop.eup %708  ;;  %v530_v32 = vsub.f32 %v917_v37, %v500_v57 }
 0x240   :  { %v711_v60 = vpop.eup %710  ;;  %553 = vst [vmem:[%s1020_s4 + $0x40] sm:$0xff] %v537_v22  ;;  %v510_v62 = vmul.f32 0.6931472, %v709_v58  ;;  %v494_v63 = vpop.xlane.xlu0 %493 }
 0x241   :  { %v492_v0 = vpop.xlane.xlu1 %491  ;;  %546 = vst [vmem:[%s1020_s4 + $0x8] sm:$0xff] %v530_v32  ;;  %v516_v1 = vmul.f32 0.6931472, %v711_v60  ;;  %720 = vlog2.f32 %v494_v63 }
 0x242   :  { %v535_v31 = vsub.f32 %v922_v43, %v510_v62  ;;  %722 = vlog2.f32 %v492_v0 }
 0x243   :  { %v713_v2 = vpop.eup %712  ;;  %v538_v37 = vsub.f32 %v919_v38, %v516_v1 }
 0x244   :  { %v715_v4 = vpop.eup %714  ;;  %551 = vst [vmem:[%s1020_s4 + $0x30] sm:$0xff] %v535_v31  ;;  %v506_v6 = vmul.f32 0.6931472, %v713_v2 }
 0x245   :  { %v496_v7 = vpop.xlane.xlu1 %495  ;;  %554 = vst [vmem:[%s1020_s4 + $0x48] sm:$0xff] %v538_v37  ;;  %v512_v8 = vmul.f32 0.6931472, %v715_v4 }
 0x246   :  { %724 = vlog2.f32 %v496_v7  ;;  %v533_v9 = vsub.f32 %v928_v51, %v506_v6 }
 0x247   :  { %v717_v43 = vpop.eup %716  ;;  %v536_v10 = vsub.f32 %v925_v45, %v512_v8 }
 0x248   :  { %v719_v11 = vpop.eup %718  ;;  %549 = vst [vmem:[%s1020_s4 + $0x20] sm:$0xff] %v533_v9  ;;  %v522_v38 = vmul.f32 0.6931472, %v717_v43 }
 0x249   :  { %552 = vst [vmem:[%s1020_s4 + $0x38] sm:$0xff] %v536_v10  ;;  %v508_v12 = vmul.f32 0.6931472, %v719_v11 }
 0x24a   :  { %v541_v13 = vsub.f32 %v936_v59, %v522_v38 }
 0x24b   :  { %v721_v14 = vpop.eup %720  ;;  %v534_v15 = vsub.f32 %v932_v53, %v508_v12 }
 0x24c   :  { %v723_v51 = vpop.eup %722  ;;  %557 = vst [vmem:[%s1020_s4 + $0x60] sm:$0xff] %v541_v13  ;;  %v526_v45 = vmul.f32 0.6931472, %v721_v14 }
 0x24d   :  { %550 = vst [vmem:[%s1020_s4 + $0x28] sm:$0xff] %v534_v15  ;;  %v524_v16 = vmul.f32 0.6931472, %v723_v51 }
 0x24e   :  { %v543_v17 = vsub.f32 %v944_v3, %v526_v45 }
 0x24f   :  { %v542_v21 = vsub.f32 %v940_v61, %v524_v16 }
 0x250   :  { %v725_v18 = vpop.eup %724  ;;  %559 = vst [vmem:[%s1020_s4 + $0x70] sm:$0xff] %v543_v17 }
 0x251   :  { %v528_v53 = vmul.f32 0.6931472, %v725_v18  ;;  %558 = vst [vmem:[%s1020_s4 + $0x68] sm:$0xff] %v542_v21 }
 0x253   :  { %v544_v59 = vsub.f32 %v948_v5, %v528_v53 }
 0x255   :  { %560 = vst [vmem:[%s1020_s4 + $0x78] sm:$0xff] %v544_v59 }

</bundles_post_ra>
